<compile_context>
chip_gen: v6e
topology: v6e:2x2x1
jax: 0.10.0
libtpu: 0.0.40
codegen_flags: <defaults>
</compile_context>

<pallas_src>
import jax
import jax.numpy as jnp
from jax.experimental import pallas as pl
from jax.experimental.pallas import tpu as pltpu


def _round_up(a, b):
    return ((a + b - 1) // b) * b


def _patch_add_kernel(prompt_ref, x_ref, o_ref):
    # prompt_ref: (1, C, R, Cb)   patch zero-padded to the aligned block,
    #                             constant across grid steps (VMEM resident).
    # x_ref/o_ref: (tb, C, R, Cb) patch-covering corner of tb images.
    # Pure VPU elementwise add; the block is tiny so the broadcast over the
    # leading 1 is negligible even if it were materialized.
    o_ref[...] = x_ref[...] + prompt_ref[...]


def fixed_patch_prompter_forward(x, patch, *, tile_budget_bytes=2 << 20):
    """x: (B, C, H, W); patch: (1, C, ps, ps).

    Returns x + prompt where prompt is zeros(C, H, W) with `patch` written into
    the top-left corner (broadcast over the batch).  Only the patch-covering,
    (8,128)-aligned region moves through VMEM; the rest of the output reuses
    x's buffer via input/output aliasing.
    """
    B, C, H, W = x.shape
    assert patch.shape[0] == 1 and patch.shape[1] == C
    ps = patch.shape[2]
    assert patch.shape[3] == ps and ps <= H and ps <= W

    # Patch-covering block aligned to the (8, 128) VMEM tile, clamped to the
    # full extent when the image is smaller than one tile in that dimension
    # (block dims must be multiples of (8, 128) or equal the full dims).
    R = H if _round_up(ps, 8) >= H else _round_up(ps, 8)
    Cb = W if _round_up(ps, 128) >= W else _round_up(ps, 128)

    # Prompt restricted to that block: patch zero-padded to (1, C, R, Cb).
    prompt_blk = jnp.pad(
        patch.astype(x.dtype), ((0, 0), (0, 0), (0, R - ps), (0, Cb - ps))
    )

    # Images per grid step: keep per-step tiles within a modest VMEM budget,
    # use a ceil-div grid (awkward batch sizes no longer collapse to tb=1),
    # and keep >= 2 steps whenever B >= 2 for v7x megacore sharding.
    per_image_bytes = C * R * Cb * x.dtype.itemsize
    tb = max(1, min(B, tile_budget_bytes // max(1, per_image_bytes)))
    if B >= 2:
        tb = min(tb, pl.cdiv(B, 2))
    grid = (pl.cdiv(B, tb),)

    return pl.pallas_call(
        _patch_add_kernel,
        out_shape=jax.ShapeDtypeStruct((B, C, H, W), x.dtype),
        grid=grid,
        in_specs=[
            # Prompt block: same block every step -> stays resident in VMEM.
            pl.BlockSpec((1, C, R, Cb), lambda i: (0, 0, 0, 0)),
            # x: only the patch-covering corner of tb images per step.
            pl.BlockSpec((tb, C, R, Cb), lambda i: (i, 0, 0, 0)),
        ],
        out_specs=pl.BlockSpec((tb, C, R, Cb), lambda i: (i, 0, 0, 0)),
        # P8: output buffer is x's buffer, so everything outside the patch
        # block is already correct and never moves through VMEM.  XLA inserts
        # a copy of x if the caller did not donate it (out-of-place semantics
        # preserved); donate x to eliminate that copy as well.
        input_output_aliases={1: 0},
        compiler_params=pltpu.CompilerParams(
            # Disjoint per-step batch blocks -> embarrassingly parallel.
            dimension_semantics=("parallel",),
            # Double-buffered in+out patch tiles (~4x tile_budget) + resident
            # prompt fit easily; 48 MiB stays under v7x's 64 MiB physical VMEM
            # and overrides v5e's small 16 MiB scoped default.
            vmem_limit_bytes=48 << 20,
        ),
    )(prompt_blk, x)


def fixed_patch_prompter_reference(x, patch):
    B, C, H, W = x.shape
    ps = patch.shape[2]
    prompt = jnp.zeros((1, C, H, W), x.dtype)
    prompt = prompt.at[:, :, :ps, :ps].set(patch.astype(x.dtype))
    return x + prompt


if __name__ == "__main__":
    # Small, module-consistent shapes: image_size=16, prompt_size=3, C=3.
    B, C = 2, 3
    image_size, prompt_size = 16, 3

    key = jax.random.PRNGKey(0)
    k_x, k_p = jax.random.split(key, 2)

    x = jax.random.normal(k_x, (B, C, image_size, image_size), jnp.float32)
    patch = jax.random.normal(k_p, (1, C, prompt_size, prompt_size), jnp.float32)

    ref = fixed_patch_prompter_reference(x, patch)

    fwd = jax.jit(fixed_patch_prompter_forward)
    out = jax.block_until_ready(fwd(x, patch))

    assert out.shape == ref.shape and out.dtype == ref.dtype
    assert jnp.allclose(out, ref, atol=1e-6, rtol=1e-6)

    print("KERNEL_OK")
</pallas_src>

<mosaic_0001>
module attributes {stable_mosaic.version = 11 : i64} {
  func.func @_patch_add_kernel(%arg0: i32, %arg1: memref<1x3x8x16xf32, #tpu.memory_space<vmem>>, %arg2: memref<1x3x8x16xf32, #tpu.memory_space<vmem>>, %arg3: memref<1x3x8x16xf32, #tpu.memory_space<vmem>>) attributes {dimension_semantics = [#tpu.dimension_semantics<parallel>], iteration_bounds = array<i64: 2>, scalar_prefetch = 0 : i64, scratch_operands = 0 : i64, tpu.core_type = #tpu.core_type<tc>, window_params = [{pipeline_mode = #tpu.pipeline_mode<synchronous>, transform_indices = @transform_0, window_bounds = array<i64: 1, 3, 8, 16>}, {transform_indices = @transform_1, window_bounds = array<i64: 1, 3, 8, 16>}, {transform_indices = @transform_2, window_bounds = array<i64: 1, 3, 8, 16>}]} {
    %c0 = arith.constant 0 : index
    %c0_0 = arith.constant 0 : index
    %c0_1 = arith.constant 0 : index
    %c0_2 = arith.constant 0 : index
    %0 = vector.load %arg2[%c0, %c0_0, %c0_1, %c0_2] : memref<1x3x8x16xf32, #tpu.memory_space<vmem>>, vector<1x3x8x16xf32>
    %c0_3 = arith.constant 0 : index
    %c0_4 = arith.constant 0 : index
    %c0_5 = arith.constant 0 : index
    %c0_6 = arith.constant 0 : index
    %1 = vector.load %arg1[%c0_3, %c0_4, %c0_5, %c0_6] : memref<1x3x8x16xf32, #tpu.memory_space<vmem>>, vector<1x3x8x16xf32>
    %2 = arith.addf %0, %1 : vector<1x3x8x16xf32>
    %c0_7 = arith.constant 0 : index
    %c0_8 = arith.constant 0 : index
    %c0_9 = arith.constant 0 : index
    %c0_10 = arith.constant 0 : index
    %3 = vector.load %arg3[%c0_7, %c0_8, %c0_9, %c0_10] : memref<1x3x8x16xf32, #tpu.memory_space<vmem>>, vector<1x3x8x16xf32>
    tpu.vector_store %arg3[%c0_7, %c0_8, %c0_9, %c0_10], %2 {strides = array<i32>} : memref<1x3x8x16xf32, #tpu.memory_space<vmem>>, vector<1x3x8x16xf32>,
    return
  }
  func.func @transform_0(%arg0: i32) -> (i32, i32, i32, i32) {
    %c0_i32 = arith.constant 0 : i32
    %c0_i32_0 = arith.constant 0 : i32
    %c0_i32_1 = arith.constant 0 : i32
    %c0_i32_2 = arith.constant 0 : i32
    %c0_i32_3 = arith.constant 0 : i32
    return %c0_i32, %c0_i32_0, %c0_i32_1, %c0_i32_2 : i32, i32, i32, i32
  }
  func.func @transform_1(%arg0: i32) -> (i32, i32, i32, i32) {
    %c0_i32 = arith.constant 0 : i32
    %c0_i32_0 = arith.constant 0 : i32
    %c0_i32_1 = arith.constant 0 : i32
    %c0_i32_2 = arith.constant 0 : i32
    return %arg0, %c0_i32, %c0_i32_0, %c0_i32_1 : i32, i32, i32, i32
  }
  func.func @transform_2(%arg0: i32) -> (i32, i32, i32, i32) {
    %c0_i32 = arith.constant 0 : i32
    %c0_i32_0 = arith.constant 0 : i32
    %c0_i32_1 = arith.constant 0 : i32
    %c0_i32_2 = arith.constant 0 : i32
    return %arg0, %c0_i32, %c0_i32_0, %c0_i32_1 : i32, i32, i32, i32
  }
}

</mosaic_0001>

<bundles_post_ra>
// kernel: fixed_patch_prompter_forward.1
= control target key start
LH: loop header
LB: loop body
LE: loop exit
PB: predicated region body
PF: predicated region fallthrough
CT: control target
= control target key end

     0   :  { %7 = vsyncpa [#allocation3], 0  ;;  %s602_s0 = inlined_call_operand.vmem [shape: f32[1,3,8,16], index: 0, kind: input, shape index: {}]   ;;  %s603_s1 = inlined_call_operand.hbm [shape: f32[2,3,16,16], index: 1, kind: input, shape index: {}, may-alias: {1,2}]   ;;  %s604_s2 = inlined_call_operand.hbm [shape: f32[2,3,16,16], index: 2, kind: output, shape index: {}, may-alias: {1,2}]  }
   0x1   :  { %9 = vsyncpa [#allocation3 + $0x1], 0 }
   0x2   :  { %10 = vsyncpa [#allocation4], 0 }
   0x3   :  { %12 = vsyncpa [#allocation4 + $0x1], 0  ;;  %s443_s9 = smov 0   ;;  %s445_s10 = smov 0  }
   0x4   :  { %s447_s11 = smov 0   ;;  %s449_s12 = smov 0  }
   0x5 LB: > { %s464_s13 = sadd.s32 4294967295, %s418_s12   ;;  %s262_s14 = sadd.s32 4294967294, %s418_s12   ;;  %s418_s12 = sphi %s449_s12, %s619_s12   ;;  %s414_s11 = sphi %s447_s11, %s618_s11   ;;  %s410_s10 = sphi %s445_s10, %s617_s10   ;;  %s406_s9 = sphi %s443_s9, %s616_s9  }
   0x6   : > { %s468_s15 = sadd.s32 1, %s418_s12   ;;  %s46_s16 = sadd.s32 1, %s414_s11 }
   0x7   : > { %s43_s17 = ssub.s32 %s418_s12, %s468_s15  ;;  %p53_p0 = scmp.ne.s32.totalorder %s414_s11, %s410_s10 }
   0x8   : > { %p44_p1 = scmp.eq.s32.totalorder %s43_s17, 0  ;;  %p54_p2 = scmp.eq.s32.totalorder %s418_s12, 0 }
   0x9   : > { %p59_p3 = scmp.ne.s32.totalorder %s410_s10, %s406_s9  ;;  %p60_p4 = scmp.eq.s32.totalorder %s464_s13, 0 }
   0xa   : > { %s480_s18 = scalar_select %p44_p1, %s414_s11, %s46_s16  }
   0xb   : > { %p55_p5 = por %p54_p2, %p53_p0  ;;  %p482_p6 = por %p60_p4, %p59_p3 }
   0xc   : > { %p83_p7 = scmp.eq.s32.totalorder %s464_s13, 1  ;;  %p89_p8 = scmp.eq.s32.totalorder %s262_s14, 1 }
   0xd   : > { %s607_s19 = scalar_select %p482_p6, 1, 0 }
   0xe   : > { %p286_p10 = scmp.lt.s32.totalorder %s418_s12, 2  ;;  %p489_p11 = por %p83_p7, %p53_p0 }
   0xf   : > { %p493_p12 = por %p89_p8, %p59_p3  ;;  %s112_s22 = sand.u32 1, %s414_s11  }
  0x10   : > { %s608_s20 = scalar_select %p489_p11, 1, 0 }
  0x11   : > { %s609_s21 = scalar_select %p493_p12, 1, 0 }
  0x12   : > { %s271_s23 = smul.u32 768, %s418_s12  ;;  %p504_p13 = pnand %p286_p10, %p55_p5 }
  0x13   : > { %s270_s24 = smul.u32 24, %s112_s22  ;;  %s511_s3 = scalar_lea.sflag [#allocation3], %s112_s22 }
  0x14   : > { %s502_s27 = scalar_lea.hbm %s603_s1, %s271_s23  ;;  %p328_p2 = pneg %p504_p13 }
  0x15   : > { %s116_s29 = scalar_lea.vmem [#allocation2], %s270_s24  ;;  %s326_s4 = scalar_lea.hbm %s502_s27, 384 }
  0x16   : > { %s123_s30 = sshll.u32 %s116_s29, 4  ;;  %p327_p1 = scmp.ne.s32.totalorder %s502_s27, %s326_s4  ;;  %s508_s30 = int_to_ptr.vmem [resolvable:$true] %s123_s30 }
  0x17   : > { %s331_s7 = scalar_lea.hbm %s603_s1, 1536  ;;  %p332_p5 = scmp.lt.s32.totalorder %s502_s27, %s603_s1 }
  0x18   : > { %p329_p3 = pnand %p328_p2, %p327_p1  ;;  %p333_p7 = scmp.lt.s32.totalorder %s331_s7, %s326_s4 }
  0x1a   : > { %p330_p4 = pneg %p329_p3  ;;  %p334_p8 = por %p333_p7, %p332_p5 }
  0x1c   : > { %p335_p10 = pnand %p334_p8, %p330_p4 }
  0x1e   : > { %338 = shalt.err (!%p335_p10)
}
  0x1f   : > { %s339_s16 = scalar_lea.vmem %s508_s30, 384  ;;  %s420_s17 = smov [#allocation2]  }
  0x20   : > { %p340_p9 = scmp.ne.s32.totalorder %s508_s30, %s339_s16  ;;  %s344_s22 = sshll.u32 %s420_s17, 4  ;;  %s345_s22 = int_to_ptr.vmem [resolvable:$false] %s344_s22 }
  0x21   : > { %s346_s23 = scalar_lea.vmem %s345_s22, 768  ;;  %p347_p3 = scmp.lt.s32.totalorder %s508_s30, %s345_s22 }
  0x22   : > { %p342_p0 = pnand %p340_p9, %p328_p2  ;;  %p348_p12 = scmp.lt.s32.totalorder %s346_s23, %s339_s16 }
  0x24   : > { %p343_p1 = pneg %p342_p0  ;;  %p349_p11 = por %p348_p12, %p347_p3 }
  0x26   : > { %p350_p6 = pnand %p349_p11, %p343_p1 }
  0x28   : > { %353 = shalt.err (!%p350_p6)
}
  0x29   : > { %s421_s24 = smov 256   ;;  %s422_s25 = smov 128  }
  0x2a   : > { %s423_s26 = smov 8   ;;  %p131_p9 = scmp.lt.s32.totalorder %s418_s12, 3 }
  0x2b   : > { %281 = dma.hbm_to_vmem [thread:$0]  (!%p504_p13), %s502_s27, 384, %s508_s30, %s511_s3, %s421_s24, %s422_s25, %s423_s26  }
  0x2c   : > { %p611_p0 = scmp.ge.s32.totalorder %s418_s12, 1 }
  0x2e   : > { %p132_p2 = pnand %p611_p0, %p131_p9 }
  0x2f   : > { %s536_s29 = sand.u32 (!%p132_p2), 1, %s410_s10   ;;  %p612_p6 = scmp.ne.s32.totalorder (!%p132_p2), %s607_s19, 0 }
  0x30   : > { %135 = sbr.rel (%p132_p2) target bundleno = 81 (0x51), region = 28  ;;  %s138_s5 = scalar_lea.sflag (!%p132_p2), [#allocation3], %s536_s29 }
  0x31   : > { %s272_s4 = smul.u32 (!%p132_p2), 24, %s536_s29 }
  0x33   : > { %s141_s6 = scalar_lea.vmem (!%p132_p2), [#allocation2], %s272_s4 }
  0x35   : > { %397 = dma.done.wait (%p612_p6), %s138_s5, 384  }
  0x36   : > { %399 = vsyncadd (%p612_p6), %s138_s5, 4294966912  ;;  %s161_s27 = scalar_lea.vmem [#allocation5], %s272_s4  ;;  %s273_s30 = smul.u32 768, %s464_s13  ;;  %v162_v0 = vld [vmem:[%s141_s6] sm:$0xff]  ;;  %vm171_vm0 = vcmask 130048   ;;  %v163_v2 = vld [vmem:[%s141_s6 + $0x8] sm:$0xff] }
  0x37   : > { %s189_s28 = sshll.u32 %s161_s27, 4  ;;  %v165_v1 = vld [vmem:[%s602_s0] sm:$0xff]  ;;  %v166_v4 = vld [vmem:[%s602_s0 + $0x8] sm:$0xff]  ;;  %v167_v6 = vld [vmem:[%s602_s0 + $0x10] sm:$0xff]  ;;  %s176_s23 = scalar_lea.sflag [#allocation4], %s536_s29  ;;  %s548_s28 = int_to_ptr.vmem [resolvable:$true] %s189_s28 }
  0x38   : > { %v168_v3 = vadd.f32 %v165_v1, %v162_v0  ;;  %v164_v5 = vld [vmem:[%s141_s6 + $0x10] sm:$0xff]  ;;  %s559_s22 = scalar_lea.hbm %s604_s2, %s273_s30  ;;  %v169_v7 = vadd.f32 %v166_v4, %v163_v2  ;;  %s354_s24 = scalar_lea.vmem %s548_s28, 384 }
  0x39   : > { %v170_v8 = vadd.f32 %v167_v6, %v164_v5  ;;  %p355_p11 = scmp.ne.s32.totalorder %s548_s28, %s354_s24  ;;  %p613_p12 = scmp.ne.s32.totalorder %s608_s20, 0 }
  0x3a   : > { %172 = vst.msk [vmem:[%s161_s27] sm:$0xff] %vm171_vm0, %v168_v3  ;;  %173 = vst.msk [vmem:[%s161_s27 + $0x8] sm:$0xff] %vm171_vm0, %v169_v7  ;;  %s424_s25 = smov [#allocation5]  }
  0x3b   : > { %174 = vst.msk [vmem:[%s161_s27 + $0x10] sm:$0xff] %vm171_vm0, %v170_v8  ;;  %p356_p13 = pnand %p355_p11, %p613_p12  ;;  %s358_s26 = sshll.u32 %s424_s25, 4  ;;  %s359_s26 = int_to_ptr.vmem [resolvable:$false] %s358_s26 }
  0x3c   : > { %s360_s4 = scalar_lea.vmem %s359_s26, 768  ;;  %p361_p5 = scmp.lt.s32.totalorder %s548_s28, %s359_s26 }
  0x3d   : > { %p357_p4 = pneg %p356_p13  ;;  %p362_p7 = scmp.lt.s32.totalorder %s360_s4, %s354_s24 }
  0x3f   : > { %p363_p8 = por %p362_p7, %p361_p5 }
  0x41   : > { %p364_p10 = pnand %p363_p8, %p357_p4 }
  0x43   : > { %367 = shalt.err (!%p364_p10)
}
  0x44   : > { %s368_s5 = scalar_lea.hbm %s559_s22, 384  ;;  %s372_s30 = scalar_lea.hbm %s604_s2, 1536 }
  0x45   : > { %p369_p1 = scmp.ne.s32.totalorder %s559_s22, %s368_s5  ;;  %p373_p0 = scmp.lt.s32.totalorder %s559_s22, %s604_s2 }
  0x46   : > { %p374_p2 = scmp.lt.s32.totalorder %s372_s30, %s368_s5 }
  0x47   : > { %p370_p3 = pnand %p369_p1, %p613_p12 }
  0x48   : > { %p375_p6 = por %p374_p2, %p373_p0 }
  0x49   : > { %p371_p9 = pneg %p370_p3 }
  0x4b   : > { %p376_p11 = pnand %p375_p6, %p371_p9 }
  0x4d   : > { %379 = shalt.err (!%p376_p11)
}
  0x4e   : > { %s425_s19 = smov 128   ;;  %s426_s8 = smov 256  }
  0x4f   : > { %s427_s13 = smov 8  }
  0x50   : > { %276 = dma.vmem_to_hbm [thread:$0]  (%p613_p12), %s548_s28, 384, %s559_s22, %s176_s23, %s425_s19, %s426_s8, %s427_s13  }
  0x51 PF: > { %s204_s14 = sand.u32 1, %s406_s9   ;;  %p614_p13 = scmp.ne.s32.totalorder %s609_s21, 0 }
  0x52   : > { %p615_p4 = scmp.ge.s32.totalorder %s418_s12, 2  ;;  %s205_s16 = scalar_lea.sflag [#allocation4], %s204_s14 }
  0x54   : > { %p283_p5 = pnand %p615_p4, %p614_p13 }
  0x56   : > { %p284_p7 = pneg %p283_p5 }
  0x58   : > { %401 = dma.done.wait (%p284_p7), %s205_s16, 384  }
  0x59   : > { %403 = vsyncadd (%p284_p7), %s205_s16, 4294966912  ;;  %p15_p8 = scmp.ge.s32.totalorder %s468_s15, 4   ;;  %s616_s9 = smov %s410_s10 }
  0x5a   : > { %s617_s10 = smov %s414_s11  ;;  %s618_s11 = smov %s480_s18 }
  0x5b   : > { %s619_s12 = smov %s468_s15  ;;  %17 = sbr.rel (!%p15_p8) target bundleno = 5 (0x5), region = 73 }
  0x60   :  { %210 = vsyncpa [#allocation3], 1 }
  0x61   :  { %212 = vsyncpa [#allocation3 + $0x1], 1 }
  0x62   :  { %213 = vsyncpa [#allocation4], 1 }
  0x63   :  { %215 = vsyncpa [#allocation4 + $0x1], 1 }

</bundles_post_ra>
